<compile_context>
chip_gen: v7x
topology: tpu7x:2x2x1
jax: 0.10.0
libtpu: 0.0.40
codegen_flags: <defaults>
</compile_context>

<pallas_src>
import functools

import jax
import jax.numpy as jnp
from jax import lax
from jax.experimental import pallas as pl
from jax.experimental.pallas import tpu as pltpu

_BN_EPS = 1e-5
_GN_EPS = 1e-5


def _round_up(x: int, m: int) -> int:
    return ((x + m - 1) // m) * m


def _detect_vmem_limit() -> int:
    # v5e/v6e have 128 MiB VMEM, v7x 64 MiB; derive the scoped limit per
    # generation and leave headroom instead of hard-coding 48 MiB.
    try:
        cap = int(getattr(pltpu.get_tpu_info(), "vmem_capacity_bytes", 64 << 20))
    except Exception:  # conservative default (v7x-sized)
        cap = 64 << 20
    return int(min(96 << 20, (cap * 5) // 8))


_VMEM_LIMIT = _detect_vmem_limit()


# ----------------------------------------------------------------------------
# Tile selection helpers (no-pad, megacore-friendly)
# ----------------------------------------------------------------------------
def _divisor_tile(dim, cap, mult):
    """Largest multiple of `mult` that divides `dim` and is <= cap (or None)."""
    best, t, hi = None, mult, min(cap, dim)
    while t <= hi:
        if dim % t == 0:
            best = t
        t += mult
    return best


def _pick_tm(M, cap=512):
    # Prefer a tile that (a) exactly divides M (no pad/slice copies) and
    # (b) leaves >= 2 steps on the parallel M axis so both v7x TCs get work.
    if M >= 16:
        t = _divisor_tile(M, min(cap, M // 2), 8)
        if t is not None:
            return t, M
    t = _divisor_tile(M, cap, 8)
    if t is not None:
        return t, M
    tm = min(cap, _round_up(M, 8))          # rare fallback: pad M
    return tm, _round_up(M, tm)


def _pick_tk(K, cap=1024):
    if K % 128 != 0:
        # Tiny first-layer K (9*3 = 27): single full-extent block, no padding.
        return K, K
    t = _divisor_tile(K, cap, 128)
    return (t if t is not None else 128), K


def _pick_tn(N, cap=512):
    # N (padded out-channels) is small for this module: cover it in one tile so
    # the big im2col matrix streams from HBM exactly once.
    if N <= cap:
        return N, N
    t = _divisor_tile(N, cap, 128)
    return (t if t is not None else 128), N


# ----------------------------------------------------------------------------
# Fused MXU matmul + per-output-channel [scale], bias, optional ReLU
#   out = act( (x @ w) [* scale] + bias ),  bf16 inputs, f32 accumulation
# ----------------------------------------------------------------------------
def _matmul_epilogue_kernel(x_ref, w_ref, *rest, relu: bool, has_scale: bool):
    if has_scale:
        s_ref, b_ref, o_ref, acc_ref = rest
    else:
        s_ref = None
        b_ref, o_ref, acc_ref = rest

    @pl.when(pl.program_id(2) == 0)
    def _init():
        acc_ref[...] = jnp.zeros_like(acc_ref)

    acc_ref[...] += jnp.dot(x_ref[...], w_ref[...],
                            preferred_element_type=jnp.float32)

    @pl.when(pl.program_id(2) == pl.num_programs(2) - 1)
    def _finalize():
        y = acc_ref[...]
        if has_scale:
            y = y * s_ref[...]
        y = y + b_ref[...]
        if relu:
            y = jnp.maximum(y, 0.0)
        o_ref[...] = y.astype(o_ref.dtype)


def fused_matmul_epilogue(x, w, bias, scale=None, *, relu=False,
                          out_dtype=jnp.float32, tm_cap=512, tk_cap=1024):
    """x:(M,K) @ w:(K,N)  [* scale[N]] + bias[N], optional ReLU.  N % 128 == 0."""
    M, K = x.shape
    K2, N = w.shape
    assert K == K2 and N % 128 == 0, (K, K2, N)

    tm, Mp = _pick_tm(M, tm_cap)
    tk, Kp = _pick_tk(K, tk_cap)
    tn, Np = _pick_tn(N)

    xb = x.astype(jnp.bfloat16)                    # feed the MXU bf16
    if Mp != M:                                    # rare fallback path
        xb = jnp.pad(xb, ((0, Mp - M), (0, 0)))
    wb = w.astype(jnp.bfloat16)

    in_specs = [
        pl.BlockSpec((tm, tk), lambda i, j, k: (i, k)),
        pl.BlockSpec((tk, tn), lambda i, j, k: (k, j)),
    ]
    operands = [xb, wb]
    if scale is not None:
        in_specs.append(pl.BlockSpec((1, tn), lambda i, j, k: (0, j)))
        operands.append(scale.reshape(1, N).astype(jnp.float32))
    in_specs.append(pl.BlockSpec((1, tn), lambda i, j, k: (0, j)))
    operands.append(bias.reshape(1, N).astype(jnp.float32))

    out = pl.pallas_call(
        functools.partial(_matmul_epilogue_kernel, relu=relu,
                          has_scale=scale is not None),
        out_shape=jax.ShapeDtypeStruct((Mp, Np), out_dtype),
        grid_spec=pltpu.PrefetchScalarGridSpec(
            num_scalar_prefetch=0,
            grid=(Mp // tm, Np // tn, Kp // tk),
            in_specs=in_specs,
            out_specs=pl.BlockSpec((tm, tn), lambda i, j, k: (i, j)),
            scratch_shapes=[pltpu.VMEM((tm, tn), jnp.float32)],
        ),
        compiler_params=pltpu.CompilerParams(
            dimension_semantics=("parallel", "parallel", "arbitrary"),
            vmem_limit_bytes=_VMEM_LIMIT),
    )(*operands)
    if Mp != M:
        out = out[:M]
    return out


# ----------------------------------------------------------------------------
# GroupNorm(1, C) == per-sample layer norm over (H, W, C_true), per-channel affine.
# Lane/sublane-dense (B, H*W, Cpad) layout; padded channels masked from the stats.
# ----------------------------------------------------------------------------
def _groupnorm_kernel(x_ref, g_ref, b_ref, o_ref, *, eps, c_valid, n_valid):
    x = x_ref[...].astype(jnp.float32)                       # (1, HW, Cp)
    mask = lax.broadcasted_iota(jnp.int32, x.shape, 2) < c_valid
    xm = jnp.where(mask, x, 0.0)
    mean = jnp.sum(xm) * (1.0 / n_valid)
    xc = jnp.where(mask, x - mean, 0.0)
    var = jnp.sum(xc * xc) * (1.0 / n_valid)
    inv = lax.rsqrt(var + eps)
    # gamma/beta are zero-padded, so padded output channels stay exactly 0.
    o_ref[...] = (xc * inv * g_ref[...] + b_ref[...]).astype(o_ref.dtype)


def groupnorm_pallas(x_nhwc, gamma_p, beta_p, c_valid, eps=_GN_EPS):
    B, H, W, Cp = x_nhwc.shape
    hw = H * W
    x3 = x_nhwc.reshape(B, hw, Cp)
    g = gamma_p.reshape(1, Cp).astype(jnp.float32)
    b = beta_p.reshape(1, Cp).astype(jnp.float32)
    out = pl.pallas_call(
        functools.partial(_groupnorm_kernel, eps=eps, c_valid=c_valid,
                          n_valid=float(hw * c_valid)),
        out_shape=jax.ShapeDtypeStruct(x3.shape, x3.dtype),
        grid=(B,),
        in_specs=[
            pl.BlockSpec((1, hw, Cp), lambda i: (i, 0, 0)),
            pl.BlockSpec((1, Cp), lambda i: (0, 0)),
            pl.BlockSpec((1, Cp), lambda i: (0, 0)),
        ],
        out_specs=pl.BlockSpec((1, hw, Cp), lambda i: (i, 0, 0)),
        compiler_params=pltpu.CompilerParams(
            dimension_semantics=("parallel",),
            vmem_limit_bytes=_VMEM_LIMIT),
    )(x3, g, b)
    return out.reshape(B, H, W, Cp)


# ----------------------------------------------------------------------------
# im2col (layout plumbing, NHWC) + parameter preparation (BN fold + lane padding)
# ----------------------------------------------------------------------------
def _im2col_nhwc(x, kh, kw, stride, pad):
    B, H, W, C = x.shape
    xp = jnp.pad(x, ((0, 0), (pad, pad), (pad, pad), (0, 0)))
    Ho = (H + 2 * pad - kh) // stride + 1
    Wo = (W + 2 * pad - kw) // stride + 1
    cols = []
    for i in range(kh):
        for j in range(kw):
            cols.append(xp[:, i:i + stride * Ho:stride,
                           j:j + stride * Wo:stride, :])
    patches = jnp.concatenate(cols, axis=-1)          # (B, Ho, Wo, kh*kw*C)
    return patches.reshape(B * Ho * Wo, kh * kw * C), Ho, Wo


def _pad_channels(c: int) -> int:
    return _round_up(c, 128)


def _prepare_basic_block(p, cin_true, pad_cin):
    """Fold BN into per-channel scale/bias; zero-pad Cin/Cout to lane width."""
    w = p["w_hwio"]                                    # (3,3,cin_true,cout_true)
    cout_true = w.shape[-1]
    cin_p = _pad_channels(cin_true) if pad_cin else cin_true
    cout_p = _pad_channels(cout_true)
    wp = jnp.zeros((3, 3, cin_p, cout_p), w.dtype).at[:, :, :cin_true, :cout_true].set(w)
    inv = 1.0 / jnp.sqrt(p["bn_var"] + _BN_EPS)
    scale = p["bn_gamma"] * inv
    bias = p["bn_beta"] + scale * (p["b"] - p["bn_mean"])
    scale_p = jnp.zeros((cout_p,), jnp.float32).at[:cout_true].set(scale)
    bias_p = jnp.zeros((cout_p,), jnp.float32).at[:cout_true].set(bias)
    return dict(w_mat=wp.reshape(9 * cin_p, cout_p), scale=scale_p,
                bias=bias_p, cout_p=cout_p)


def _prepare_conv5(p, c_true):
    cp = _pad_channels(c_true)
    w = jnp.zeros((cp, cp), jnp.float32).at[:c_true, :c_true].set(p["w"])
    b = jnp.zeros((cp,), jnp.float32).at[:c_true].set(p["b"])
    return dict(w=w, b=b)


def basic_block_pallas(x_nhwc, prep, stride):
    B = x_nhwc.shape[0]
    patches, Ho, Wo = _im2col_nhwc(x_nhwc, 3, 3, stride, 1)
    y = fused_matmul_epilogue(patches, prep["w_mat"], prep["bias"],
                              scale=prep["scale"], relu=True)
    return y.reshape(B, Ho, Wo, prep["cout_p"])


def conv5_pallas(x_nhwc, prep):
    B, H, W, Cp = x_nhwc.shape
    y = fused_matmul_epilogue(x_nhwc.reshape(B * H * W, Cp), prep["w"], prep["b"],
                              scale=None, relu=False)
    return y.reshape(B, H, W, Cp)


# ----------------------------------------------------------------------------
# Module-equivalent forward (NCHW in / NCHW out, like PyTorch)
# ----------------------------------------------------------------------------
def patch_embedding_forward(x_nchw, params, *, spect=False):
    if spect:
        # TODO(synk): spectral gating path (FFT) not implemented in Pallas.
        raise NotImplementedError("spect=True path not supported")
    cin = x_nchw.shape[1]
    cout = params["conv5"]["w"].shape[1]
    c_half = params["conv1"]["w_hwio"].shape[-1]

    # Fold BN + zero-pad all channel dims to 128 lanes ONCE (weights are tiny);
    # activations then carry the padded channel dim end-to-end.
    p1 = _prepare_basic_block(params["conv1"], cin, pad_cin=False)
    p2 = _prepare_basic_block(params["conv2"], c_half, pad_cin=True)
    p3 = _prepare_basic_block(params["conv3"], cout, pad_cin=True)
    p4 = _prepare_basic_block(params["conv4"], cout, pad_cin=True)
    p5 = _prepare_conv5(params["conv5"], cout)
    cp = _pad_channels(cout)
    gamma_p = jnp.zeros((cp,), jnp.float32).at[:cout].set(params["gn"]["gamma"])
    beta_p = jnp.zeros((cp,), jnp.float32).at[:cout].set(params["gn"]["beta"])

    x = jnp.transpose(x_nchw, (0, 2, 3, 1))            # NCHW -> NHWC
    x = basic_block_pallas(x, p1, stride=2)
    x = basic_block_pallas(x, p2, stride=2)
    x = basic_block_pallas(x, p3, stride=1)
    x = basic_block_pallas(x, p4, stride=1)
    x = conv5_pallas(x, p5)
    x = groupnorm_pallas(x, gamma_p, beta_p, c_valid=cout)
    x = x[..., :cout]                                  # drop channel padding once
    return jnp.transpose(x, (0, 3, 1, 2)).astype(x_nchw.dtype)


# ----------------------------------------------------------------------------
# Parameters (deterministic) and a pure-JAX reference of the PyTorch forward
# ----------------------------------------------------------------------------
def init_params(key, in_channels, out_channels):
    c_half = out_channels // 2
    layer_dims = [(in_channels, c_half), (c_half, out_channels),
                  (out_channels, out_channels), (out_channels, out_channels)]
    keys = iter(jax.random.split(key, 6 * 4 + 4))
    params = {}
    for idx, (cin, cout) in enumerate(layer_dims, start=1):
        params[f"conv{idx}"] = dict(
            w_hwio=0.1 * jax.random.normal(next(keys), (3, 3, cin, cout), jnp.float32),
            b=0.1 * jax.random.normal(next(keys), (cout,), jnp.float32),
            bn_gamma=1.0 + 0.1 * jax.random.normal(next(keys), (cout,), jnp.float32),
            bn_beta=0.1 * jax.random.normal(next(keys), (cout,), jnp.float32),
            bn_mean=0.1 * jax.random.normal(next(keys), (cout,), jnp.float32),
            bn_var=1.0 + 0.1 * jnp.abs(jax.random.normal(next(keys), (cout,), jnp.float32)),
        )
    params["conv5"] = dict(
        w=0.1 * jax.random.normal(next(keys), (out_channels, out_channels), jnp.float32),
        b=0.1 * jax.random.normal(next(keys), (out_channels,), jnp.float32),
    )
    params["gn"] = dict(
        gamma=1.0 + 0.1 * jax.random.normal(next(keys), (out_channels,), jnp.float32),
        beta=0.1 * jax.random.normal(next(keys), (out_channels,), jnp.float32),
    )
    return params


def _reference_forward(x_nchw, params):
    x = jnp.transpose(x_nchw, (0, 2, 3, 1)).astype(jnp.float32)

    def conv_bn_relu(x, p, stride):
        y = lax.conv_general_dilated(
            x, p["w_hwio"], (stride, stride), [(1, 1), (1, 1)],
            dimension_numbers=("NHWC", "HWIO", "NHWC"),
            precision=lax.Precision.HIGHEST)
        y = y + p["b"]
        y = (y - p["bn_mean"]) / jnp.sqrt(p["bn_var"] + _BN_EPS) * p["bn_gamma"] + p["bn_beta"]
        return jnp.maximum(y, 0.0)

    x = conv_bn_relu(x, params["conv1"], 2)
    x = conv_bn_relu(x, params["conv2"], 2)
    x = conv_bn_relu(x, params["conv3"], 1)
    x = conv_bn_relu(x, params["conv4"], 1)
    x = jnp.einsum("bhwc,cd->bhwd", x, params["conv5"]["w"],
                   precision=lax.Precision.HIGHEST) + params["conv5"]["b"]
    mean = jnp.mean(x, axis=(1, 2, 3), keepdims=True)
    var = jnp.mean(jnp.square(x - mean), axis=(1, 2, 3), keepdims=True)
    x = (x - mean) * lax.rsqrt(var + _GN_EPS) * params["gn"]["gamma"] + params["gn"]["beta"]
    return jnp.transpose(x, (0, 3, 1, 2))


if __name__ == "__main__":
    key = jax.random.PRNGKey(0)
    B, Cin, H, W = 2, 3, 16, 16
    Cout = 32

    k_x, k_p = jax.random.split(key)
    x = jax.random.normal(k_x, (B, Cin, H, W), dtype=jnp.float32)
    params = init_params(k_p, Cin, Cout)

    fwd = jax.jit(patch_embedding_forward)
    out = jax.block_until_ready(fwd(x, params))

    ref = _reference_forward(x, params)
    assert out.shape == (B, Cout, H // 4, W // 4), out.shape
    assert out.dtype == x.dtype
    # Tolerance accounts for bf16 MXU inputs (f32 accumulation) vs the f32
    # HIGHEST-precision reference across 5 layers + GroupNorm.
    max_err = float(jnp.max(jnp.abs(out - ref)))
    assert jnp.allclose(out, ref, atol=5e-2, rtol=5e-2), max_err

    print("KERNEL_OK")
</pallas_src>

<mosaic_0001>
module attributes {stable_mosaic.version = 11 : i64} {
  func.func @_matmul_epilogue_kernel(%arg0: i32, %arg1: i32, %arg2: i32, %arg3: memref<64x27xbf16, #tpu.memory_space<vmem>>, %arg4: memref<27x128xbf16, #tpu.memory_space<vmem>>, %arg5: memref<1x128xf32, #tpu.memory_space<vmem>>, %arg6: memref<1x128xf32, #tpu.memory_space<vmem>>, %arg7: memref<64x128xf32, #tpu.memory_space<vmem>>, %arg8: memref<64x128xf32, #tpu.memory_space<vmem>>) attributes {dimension_semantics = [#tpu.dimension_semantics<parallel>, #tpu.dimension_semantics<parallel>, #tpu.dimension_semantics<arbitrary>], iteration_bounds = array<i64: 2, 1, 1>, scalar_prefetch = 0 : i64, scratch_operands = 1 : i64, tpu.core_type = #tpu.core_type<tc>, window_params = [{transform_indices = @transform_0, window_bounds = array<i64: 64, 27>}, {transform_indices = @transform_1, window_bounds = array<i64: 27, 128>}, {transform_indices = @transform_2, window_bounds = array<i64: 1, 128>}, {transform_indices = @transform_3, window_bounds = array<i64: 1, 128>}, {transform_indices = @transform_4, window_bounds = array<i64: 64, 128>}]} {
    %c0_i32 = arith.constant 0 : i32
    %0 = arith.cmpi eq, %arg2, %c0_i32 : i32
    %1 = arith.extui %0 : i1 to i32
    %c0_i32_0 = arith.constant 0 : i32
    %2 = arith.cmpi ne, %1, %c0_i32_0 : i32
    scf.if %2 {
      %cst_10 = arith.constant 0.000000e+00 : f32
      %12 = vector.broadcast %cst_10 : f32 to vector<64x128xf32>
      %c0_11 = arith.constant 0 : index
      %c0_12 = arith.constant 0 : index
      %13 = vector.load %arg8[%c0_11, %c0_12] : memref<64x128xf32, #tpu.memory_space<vmem>>, vector<64x128xf32>
      tpu.vector_store %arg8[%c0_11, %c0_12], %12 {strides = array<i32>} : memref<64x128xf32, #tpu.memory_space<vmem>>, vector<64x128xf32>,
    } else {
    }
    %c0 = arith.constant 0 : index
    %c0_1 = arith.constant 0 : index
    %3 = vector.load %arg8[%c0, %c0_1] : memref<64x128xf32, #tpu.memory_space<vmem>>, vector<64x128xf32>
    %c0_2 = arith.constant 0 : index
    %c0_3 = arith.constant 0 : index
    %4 = vector.load %arg3[%c0_2, %c0_3] : memref<64x27xbf16, #tpu.memory_space<vmem>>, vector<64x27xbf16>
    %c0_4 = arith.constant 0 : index
    %c0_5 = arith.constant 0 : index
    %5 = vector.load %arg4[%c0_4, %c0_5] : memref<27x128xbf16, #tpu.memory_space<vmem>>, vector<27x128xbf16>
    %cst = arith.constant dense<0.000000e+00> : vector<64x128xf32>
    %6 = tpu.matmul %4, %5, %cst {dimension_numbers = #tpu.dot_dimension_numbers<[1], [0], [0], [1], [0, 0, 1, 1], [], []>} : vector<64x27xbf16>, vector<27x128xbf16>, vector<64x128xf32> -> vector<64x128xf32>
    %7 = arith.addf %3, %6 : vector<64x128xf32>
    %c0_6 = arith.constant 0 : index
    %c0_7 = arith.constant 0 : index
    %8 = vector.load %arg8[%c0_6, %c0_7] : memref<64x128xf32, #tpu.memory_space<vmem>>, vector<64x128xf32>
    tpu.vector_store %arg8[%c0_6, %c0_7], %7 {strides = array<i32>} : memref<64x128xf32, #tpu.memory_space<vmem>>, vector<64x128xf32>,
    %c0_i32_8 = arith.constant 0 : i32
    %9 = arith.cmpi eq, %arg2, %c0_i32_8 : i32
    %10 = arith.extui %9 : i1 to i32
    %c0_i32_9 = arith.constant 0 : i32
    %11 = arith.cmpi ne, %10, %c0_i32_9 : i32
    scf.if %11 {
      %c0_10 = arith.constant 0 : index
      %c0_11 = arith.constant 0 : index
      %12 = vector.load %arg8[%c0_10, %c0_11] : memref<64x128xf32, #tpu.memory_space<vmem>>, vector<64x128xf32>
      %c0_12 = arith.constant 0 : index
      %c0_13 = arith.constant 0 : index
      %13 = vector.load %arg5[%c0_12, %c0_13] : memref<1x128xf32, #tpu.memory_space<vmem>>, vector<1x128xf32>
      %14 = vector.broadcast %13 : vector<1x128xf32> to vector<64x128xf32>
      %15 = arith.mulf %12, %14 : vector<64x128xf32>
      %c0_14 = arith.constant 0 : index
      %c0_15 = arith.constant 0 : index
      %16 = vector.load %arg6[%c0_14, %c0_15] : memref<1x128xf32, #tpu.memory_space<vmem>>, vector<1x128xf32>
      %17 = vector.broadcast %16 : vector<1x128xf32> to vector<64x128xf32>
      %18 = arith.addf %15, %17 : vector<64x128xf32>
      %cst_16 = arith.constant 0.000000e+00 : f32
      %19 = vector.broadcast %cst_16 : f32 to vector<64x128xf32>
      %20 = arith.maximumf %18, %19 : vector<64x128xf32>
      %c0_17 = arith.constant 0 : index
      %c0_18 = arith.constant 0 : index
      %21 = vector.load %arg7[%c0_17, %c0_18] : memref<64x128xf32, #tpu.memory_space<vmem>>, vector<64x128xf32>
      tpu.vector_store %arg7[%c0_17, %c0_18], %20 {strides = array<i32>} : memref<64x128xf32, #tpu.memory_space<vmem>>, vector<64x128xf32>,
    } else {
    }
    return
  }
  func.func @transform_0(%arg0: i32, %arg1: i32, %arg2: i32) -> (i32, i32) {
    %c0_i32 = arith.constant 0 : i32
    return %arg0, %arg2 : i32, i32
  }
  func.func @transform_1(%arg0: i32, %arg1: i32, %arg2: i32) -> (i32, i32) {
    %c0_i32 = arith.constant 0 : i32
    return %arg2, %arg1 : i32, i32
  }
  func.func @transform_2(%arg0: i32, %arg1: i32, %arg2: i32) -> (i32, i32) {
    %c0_i32 = arith.constant 0 : i32
    %c0_i32_0 = arith.constant 0 : i32
    return %c0_i32, %arg1 : i32, i32
  }
  func.func @transform_3(%arg0: i32, %arg1: i32, %arg2: i32) -> (i32, i32) {
    %c0_i32 = arith.constant 0 : i32
    %c0_i32_0 = arith.constant 0 : i32
    return %c0_i32, %arg1 : i32, i32
  }
  func.func @transform_4(%arg0: i32, %arg1: i32, %arg2: i32) -> (i32, i32) {
    %c0_i32 = arith.constant 0 : i32
    return %arg0, %arg1 : i32, i32
  }
}

module attributes {stable_mosaic.version = 11 : i64} {
  func.func @_matmul_epilogue_kernel(%arg0: i32, %arg1: i32, %arg2: i32, %arg3: memref<16x384xbf16, #tpu.memory_space<vmem>>, %arg4: memref<384x128xbf16, #tpu.memory_space<vmem>>, %arg5: memref<1x128xf32, #tpu.memory_space<vmem>>, %arg6: memref<1x128xf32, #tpu.memory_space<vmem>>, %arg7: memref<16x128xf32, #tpu.memory_space<vmem>>, %arg8: memref<16x128xf32, #tpu.memory_space<vmem>>) attributes {dimension_semantics = [#tpu.dimension_semantics<parallel>, #tpu.dimension_semantics<parallel>, #tpu.dimension_semantics<arbitrary>], iteration_bounds = array<i64: 2, 1, 3>, scalar_prefetch = 0 : i64, scratch_operands = 1 : i64, tpu.core_type = #tpu.core_type<tc>, window_params = [{transform_indices = @transform_0, window_bounds = array<i64: 16, 384>}, {transform_indices = @transform_1, window_bounds = array<i64: 384, 128>}, {transform_indices = @transform_2, window_bounds = array<i64: 1, 128>}, {transform_indices = @transform_3, window_bounds = array<i64: 1, 128>}, {transform_indices = @transform_4, window_bounds = array<i64: 16, 128>}]} {
    %c0_i32 = arith.constant 0 : i32
    %0 = arith.cmpi eq, %arg2, %c0_i32 : i32
    %1 = arith.extui %0 : i1 to i32
    %c0_i32_0 = arith.constant 0 : i32
    %2 = arith.cmpi ne, %1, %c0_i32_0 : i32
    scf.if %2 {
      %cst_9 = arith.constant 0.000000e+00 : f32
      %12 = vector.broadcast %cst_9 : f32 to vector<16x128xf32>
      %c0_10 = arith.constant 0 : index
      %c0_11 = arith.constant 0 : index
      %13 = vector.load %arg8[%c0_10, %c0_11] : memref<16x128xf32, #tpu.memory_space<vmem>>, vector<16x128xf32>
      tpu.vector_store %arg8[%c0_10, %c0_11], %12 {strides = array<i32>} : memref<16x128xf32, #tpu.memory_space<vmem>>, vector<16x128xf32>,
    } else {
    }
    %c0 = arith.constant 0 : index
    %c0_1 = arith.constant 0 : index
    %3 = vector.load %arg8[%c0, %c0_1] : memref<16x128xf32, #tpu.memory_space<vmem>>, vector<16x128xf32>
    %c0_2 = arith.constant 0 : index
    %c0_3 = arith.constant 0 : index
    %4 = vector.load %arg3[%c0_2, %c0_3] : memref<16x384xbf16, #tpu.memory_space<vmem>>, vector<16x384xbf16>
    %c0_4 = arith.constant 0 : index
    %c0_5 = arith.constant 0 : index
    %5 = vector.load %arg4[%c0_4, %c0_5] : memref<384x128xbf16, #tpu.memory_space<vmem>>, vector<384x128xbf16>
    %cst = arith.constant dense<0.000000e+00> : vector<16x128xf32>
    %6 = tpu.matmul %4, %5, %cst {dimension_numbers = #tpu.dot_dimension_numbers<[1], [0], [0], [1], [0, 0, 1, 1], [], []>} : vector<16x384xbf16>, vector<384x128xbf16>, vector<16x128xf32> -> vector<16x128xf32>
    %7 = arith.addf %3, %6 : vector<16x128xf32>
    %c0_6 = arith.constant 0 : index
    %c0_7 = arith.constant 0 : index
    %8 = vector.load %arg8[%c0_6, %c0_7] : memref<16x128xf32, #tpu.memory_space<vmem>>, vector<16x128xf32>
    tpu.vector_store %arg8[%c0_6, %c0_7], %7 {strides = array<i32>} : memref<16x128xf32, #tpu.memory_space<vmem>>, vector<16x128xf32>,
    %c2_i32 = arith.constant 2 : i32
    %9 = arith.cmpi eq, %arg2, %c2_i32 : i32
    %10 = arith.extui %9 : i1 to i32
    %c0_i32_8 = arith.constant 0 : i32
    %11 = arith.cmpi ne, %10, %c0_i32_8 : i32
    scf.if %11 {
      %c0_9 = arith.constant 0 : index
      %c0_10 = arith.constant 0 : index
      %12 = vector.load %arg8[%c0_9, %c0_10] : memref<16x128xf32, #tpu.memory_space<vmem>>, vector<16x128xf32>
      %c0_11 = arith.constant 0 : index
      %c0_12 = arith.constant 0 : index
      %13 = vector.load %arg5[%c0_11, %c0_12] : memref<1x128xf32, #tpu.memory_space<vmem>>, vector<1x128xf32>
      %14 = vector.broadcast %13 : vector<1x128xf32> to vector<16x128xf32>
      %15 = arith.mulf %12, %14 : vector<16x128xf32>
      %c0_13 = arith.constant 0 : index
      %c0_14 = arith.constant 0 : index
      %16 = vector.load %arg6[%c0_13, %c0_14] : memref<1x128xf32, #tpu.memory_space<vmem>>, vector<1x128xf32>
      %17 = vector.broadcast %16 : vector<1x128xf32> to vector<16x128xf32>
      %18 = arith.addf %15, %17 : vector<16x128xf32>
      %cst_15 = arith.constant 0.000000e+00 : f32
      %19 = vector.broadcast %cst_15 : f32 to vector<16x128xf32>
      %20 = arith.maximumf %18, %19 : vector<16x128xf32>
      %c0_16 = arith.constant 0 : index
      %c0_17 = arith.constant 0 : index
      %21 = vector.load %arg7[%c0_16, %c0_17] : memref<16x128xf32, #tpu.memory_space<vmem>>, vector<16x128xf32>
      tpu.vector_store %arg7[%c0_16, %c0_17], %20 {strides = array<i32>} : memref<16x128xf32, #tpu.memory_space<vmem>>, vector<16x128xf32>,
    } else {
    }
    return
  }
  func.func @transform_0(%arg0: i32, %arg1: i32, %arg2: i32) -> (i32, i32) {
    %c0_i32 = arith.constant 0 : i32
    return %arg0, %arg2 : i32, i32
  }
  func.func @transform_1(%arg0: i32, %arg1: i32, %arg2: i32) -> (i32, i32) {
    %c0_i32 = arith.constant 0 : i32
    return %arg2, %arg1 : i32, i32
  }
  func.func @transform_2(%arg0: i32, %arg1: i32, %arg2: i32) -> (i32, i32) {
    %c0_i32 = arith.constant 0 : i32
    %c0_i32_0 = arith.constant 0 : i32
    return %c0_i32, %arg1 : i32, i32
  }
  func.func @transform_3(%arg0: i32, %arg1: i32, %arg2: i32) -> (i32, i32) {
    %c0_i32 = arith.constant 0 : i32
    %c0_i32_0 = arith.constant 0 : i32
    return %c0_i32, %arg1 : i32, i32
  }
  func.func @transform_4(%arg0: i32, %arg1: i32, %arg2: i32) -> (i32, i32) {
    %c0_i32 = arith.constant 0 : i32
    return %arg0, %arg1 : i32, i32
  }
}

module attributes {stable_mosaic.version = 11 : i64} {
  func.func @_matmul_epilogue_kernel(%arg0: i32, %arg1: i32, %arg2: i32, %arg3: memref<16x128xbf16, #tpu.memory_space<vmem>>, %arg4: memref<128x128xbf16, #tpu.memory_space<vmem>>, %arg5: memref<1x128xf32, #tpu.memory_space<vmem>>, %arg6: memref<16x128xf32, #tpu.memory_space<vmem>>, %arg7: memref<16x128xf32, #tpu.memory_space<vmem>>) attributes {dimension_semantics = [#tpu.dimension_semantics<parallel>, #tpu.dimension_semantics<parallel>, #tpu.dimension_semantics<arbitrary>], iteration_bounds = array<i64: 2, 1, 1>, scalar_prefetch = 0 : i64, scratch_operands = 1 : i64, tpu.core_type = #tpu.core_type<tc>, window_params = [{transform_indices = @transform_0, window_bounds = array<i64: 16, 128>}, {transform_indices = @transform_1, window_bounds = array<i64: 128, 128>}, {transform_indices = @transform_2, window_bounds = array<i64: 1, 128>}, {transform_indices = @transform_3, window_bounds = array<i64: 16, 128>}]} {
    %c0_i32 = arith.constant 0 : i32
    %0 = arith.cmpi eq, %arg2, %c0_i32 : i32
    %1 = arith.extui %0 : i1 to i32
    %c0_i32_0 = arith.constant 0 : i32
    %2 = arith.cmpi ne, %1, %c0_i32_0 : i32
    scf.if %2 {
      %cst_10 = arith.constant 0.000000e+00 : f32
      %12 = vector.broadcast %cst_10 : f32 to vector<16x128xf32>
      %c0_11 = arith.constant 0 : index
      %c0_12 = arith.constant 0 : index
      %13 = vector.load %arg7[%c0_11, %c0_12] : memref<16x128xf32, #tpu.memory_space<vmem>>, vector<16x128xf32>
      tpu.vector_store %arg7[%c0_11, %c0_12], %12 {strides = array<i32>} : memref<16x128xf32, #tpu.memory_space<vmem>>, vector<16x128xf32>,
    } else {
    }
    %c0 = arith.constant 0 : index
    %c0_1 = arith.constant 0 : index
    %3 = vector.load %arg7[%c0, %c0_1] : memref<16x128xf32, #tpu.memory_space<vmem>>, vector<16x128xf32>
    %c0_2 = arith.constant 0 : index
    %c0_3 = arith.constant 0 : index
    %4 = vector.load %arg3[%c0_2, %c0_3] : memref<16x128xbf16, #tpu.memory_space<vmem>>, vector<16x128xbf16>
    %c0_4 = arith.constant 0 : index
    %c0_5 = arith.constant 0 : index
    %5 = vector.load %arg4[%c0_4, %c0_5] : memref<128x128xbf16, #tpu.memory_space<vmem>>, vector<128x128xbf16>
    %cst = arith.constant dense<0.000000e+00> : vector<16x128xf32>
    %6 = tpu.matmul %4, %5, %cst {dimension_numbers = #tpu.dot_dimension_numbers<[1], [0], [0], [1], [0, 0, 1, 1], [], []>} : vector<16x128xbf16>, vector<128x128xbf16>, vector<16x128xf32> -> vector<16x128xf32>
    %7 = arith.addf %3, %6 : vector<16x128xf32>
    %c0_6 = arith.constant 0 : index
    %c0_7 = arith.constant 0 : index
    %8 = vector.load %arg7[%c0_6, %c0_7] : memref<16x128xf32, #tpu.memory_space<vmem>>, vector<16x128xf32>
    tpu.vector_store %arg7[%c0_6, %c0_7], %7 {strides = array<i32>} : memref<16x128xf32, #tpu.memory_space<vmem>>, vector<16x128xf32>,
    %c0_i32_8 = arith.constant 0 : i32
    %9 = arith.cmpi eq, %arg2, %c0_i32_8 : i32
    %10 = arith.extui %9 : i1 to i32
    %c0_i32_9 = arith.constant 0 : i32
    %11 = arith.cmpi ne, %10, %c0_i32_9 : i32
    scf.if %11 {
      %c0_10 = arith.constant 0 : index
      %c0_11 = arith.constant 0 : index
      %12 = vector.load %arg7[%c0_10, %c0_11] : memref<16x128xf32, #tpu.memory_space<vmem>>, vector<16x128xf32>
      %c0_12 = arith.constant 0 : index
      %c0_13 = arith.constant 0 : index
      %13 = vector.load %arg5[%c0_12, %c0_13] : memref<1x128xf32, #tpu.memory_space<vmem>>, vector<1x128xf32>
      %14 = vector.broadcast %13 : vector<1x128xf32> to vector<16x128xf32>
      %15 = arith.addf %12, %14 : vector<16x128xf32>
      %c0_14 = arith.constant 0 : index
      %c0_15 = arith.constant 0 : index
      %16 = vector.load %arg6[%c0_14, %c0_15] : memref<16x128xf32, #tpu.memory_space<vmem>>, vector<16x128xf32>
      tpu.vector_store %arg6[%c0_14, %c0_15], %15 {strides = array<i32>} : memref<16x128xf32, #tpu.memory_space<vmem>>, vector<16x128xf32>,
    } else {
    }
    return
  }
  func.func @transform_0(%arg0: i32, %arg1: i32, %arg2: i32) -> (i32, i32) {
    %c0_i32 = arith.constant 0 : i32
    return %arg0, %arg2 : i32, i32
  }
  func.func @transform_1(%arg0: i32, %arg1: i32, %arg2: i32) -> (i32, i32) {
    %c0_i32 = arith.constant 0 : i32
    return %arg2, %arg1 : i32, i32
  }
  func.func @transform_2(%arg0: i32, %arg1: i32, %arg2: i32) -> (i32, i32) {
    %c0_i32 = arith.constant 0 : i32
    %c0_i32_0 = arith.constant 0 : i32
    return %c0_i32, %arg1 : i32, i32
  }
  func.func @transform_3(%arg0: i32, %arg1: i32, %arg2: i32) -> (i32, i32) {
    %c0_i32 = arith.constant 0 : i32
    return %arg0, %arg1 : i32, i32
  }
}

module attributes {stable_mosaic.version = 11 : i64} {
  func.func @_groupnorm_kernel(%arg0: i32, %arg1: memref<1x16x128xf32, #tpu.memory_space<vmem>>, %arg2: memref<1x128xf32, #tpu.memory_space<vmem>>, %arg3: memref<1x128xf32, #tpu.memory_space<vmem>>, %arg4: memref<1x16x128xf32, #tpu.memory_space<vmem>>) attributes {dimension_semantics = [#tpu.dimension_semantics<parallel>], iteration_bounds = array<i64: 2>, scalar_prefetch = 0 : i64, scratch_operands = 0 : i64, tpu.core_type = #tpu.core_type<tc>, window_params = [{transform_indices = @transform_0, window_bounds = array<i64: 1, 16, 128>}, {pipeline_mode = #tpu.pipeline_mode<synchronous>, transform_indices = @transform_1, window_bounds = array<i64: 1, 128>}, {pipeline_mode = #tpu.pipeline_mode<synchronous>, transform_indices = @transform_2, window_bounds = array<i64: 1, 128>}, {transform_indices = @transform_3, window_bounds = array<i64: 1, 16, 128>}]} {
    %c0 = arith.constant 0 : index
    %c0_0 = arith.constant 0 : index
    %c0_1 = arith.constant 0 : index
    %0 = vector.load %arg1[%c0, %c0_0, %c0_1] : memref<1x16x128xf32, #tpu.memory_space<vmem>>, vector<1x16x128xf32>
    %1 = tpu.iota {dimensions = array<i32: 2>} : vector<1x16x128xi32>
    %c32_i32 = arith.constant 32 : i32
    %2 = vector.broadcast %c32_i32 : i32 to vector<1x16x128xi32>
    %3 = arith.cmpi slt, %1, %2 : vector<1x16x128xi32>
    %cst = arith.constant 0.000000e+00 : f32
    %4 = vector.broadcast %cst : f32 to vector<1x16x128xf32>
    %5 = arith.select %3, %0, %4 : vector<1x16x128xi1>, vector<1x16x128xf32>
    %6 = vector.shape_cast %5 : vector<1x16x128xf32> to vector<1x1x16x128xf32>
    %cst_2 = arith.constant dense<0.000000e+00> : vector<1xf32>
    %7 = vector.multi_reduction <add>, %6, %cst_2 [1, 2, 3] : vector<1x1x16x128xf32> to vector<1xf32>
    %8 = vector.shape_cast %7 : vector<1xf32> to vector<1x1x1x1xf32>
    %9 = vector.extract %8[0, 0, 0, 0] : f32 from vector<1x1x1x1xf32>
    %cst_3 = arith.constant 0.001953125 : f32
    %10 = arith.mulf %9, %cst_3 : f32
    %11 = vector.broadcast %10 : f32 to vector<1x16x128xf32>
    %12 = arith.subf %0, %11 : vector<1x16x128xf32>
    %cst_4 = arith.constant 0.000000e+00 : f32
    %13 = vector.broadcast %cst_4 : f32 to vector<1x16x128xf32>
    %14 = arith.select %3, %12, %13 : vector<1x16x128xi1>, vector<1x16x128xf32>
    %15 = arith.mulf %14, %14 : vector<1x16x128xf32>
    %16 = vector.shape_cast %15 : vector<1x16x128xf32> to vector<1x1x16x128xf32>
    %cst_5 = arith.constant dense<0.000000e+00> : vector<1xf32>
    %17 = vector.multi_reduction <add>, %16, %cst_5 [1, 2, 3] : vector<1x1x16x128xf32> to vector<1xf32>
    %18 = vector.shape_cast %17 : vector<1xf32> to vector<1x1x1x1xf32>
    %19 = vector.extract %18[0, 0, 0, 0] : f32 from vector<1x1x1x1xf32>
    %cst_6 = arith.constant 0.001953125 : f32
    %20 = arith.mulf %19, %cst_6 : f32
    %cst_7 = arith.constant 9.99999974E-6 : f32
    %21 = arith.addf %20, %cst_7 : f32
    %22 = math.rsqrt %21 : f32
    %23 = vector.broadcast %22 : f32 to vector<1x16x128xf32>
    %24 = arith.mulf %14, %23 : vector<1x16x128xf32>
    %c0_8 = arith.constant 0 : index
    %c0_9 = arith.constant 0 : index
    %25 = vector.load %arg2[%c0_8, %c0_9] : memref<1x128xf32, #tpu.memory_space<vmem>>, vector<1x128xf32>
    %26 = vector.shape_cast %25 : vector<1x128xf32> to vector<1x1x128xf32>
    %27 = vector.broadcast %26 : vector<1x1x128xf32> to vector<1x16x128xf32>
    %28 = arith.mulf %24, %27 : vector<1x16x128xf32>
    %c0_10 = arith.constant 0 : index
    %c0_11 = arith.constant 0 : index
    %29 = vector.load %arg3[%c0_10, %c0_11] : memref<1x128xf32, #tpu.memory_space<vmem>>, vector<1x128xf32>
    %30 = vector.shape_cast %29 : vector<1x128xf32> to vector<1x1x128xf32>
    %31 = vector.broadcast %30 : vector<1x1x128xf32> to vector<1x16x128xf32>
    %32 = arith.addf %28, %31 : vector<1x16x128xf32>
    %c0_12 = arith.constant 0 : index
    %c0_13 = arith.constant 0 : index
    %c0_14 = arith.constant 0 : index
    %33 = vector.load %arg4[%c0_12, %c0_13, %c0_14] : memref<1x16x128xf32, #tpu.memory_space<vmem>>, vector<1x16x128xf32>
    tpu.vector_store %arg4[%c0_12, %c0_13, %c0_14], %32 {strides = array<i32>} : memref<1x16x128xf32, #tpu.memory_space<vmem>>, vector<1x16x128xf32>,
    return
  }
  func.func @transform_0(%arg0: i32) -> (i32, i32, i32) {
    %c0_i32 = arith.constant 0 : i32
    %c0_i32_0 = arith.constant 0 : i32
    %c0_i32_1 = arith.constant 0 : i32
    return %arg0, %c0_i32, %c0_i32_0 : i32, i32, i32
  }
  func.func @transform_1(%arg0: i32) -> (i32, i32) {
    %c0_i32 = arith.constant 0 : i32
    %c0_i32_0 = arith.constant 0 : i32
    %c0_i32_1 = arith.constant 0 : i32
    return %c0_i32, %c0_i32_0 : i32, i32
  }
  func.func @transform_2(%arg0: i32) -> (i32, i32) {
    %c0_i32 = arith.constant 0 : i32
    %c0_i32_0 = arith.constant 0 : i32
    %c0_i32_1 = arith.constant 0 : i32
    return %c0_i32, %c0_i32_0 : i32, i32
  }
  func.func @transform_3(%arg0: i32) -> (i32, i32, i32) {
    %c0_i32 = arith.constant 0 : i32
    %c0_i32_0 = arith.constant 0 : i32
    %c0_i32_1 = arith.constant 0 : i32
    return %arg0, %c0_i32, %c0_i32_0 : i32, i32, i32
  }
}

</mosaic_0001>

<bundles_post_ra>
// kernel: patch_embedding_forward.6
= control target key start
LH: loop header
LB: loop body
LE: loop exit
PB: predicated region body
PF: predicated region fallthrough
CT: control target
= control target key end

     0   :  { %s774_s15 = smov 0   ;;  %s776_s16 = smov 0   ;;  %s823_s0 = inlined_call_operand.vmem [shape: bf16[128,27], index: 0, kind: input, shape index: {}]   ;;  %s824_s1 = inlined_call_operand.vmem [shape: bf16[27,128], index: 1, kind: input, shape index: {}]   ;;  %s825_s2 = inlined_call_operand.vmem [shape: f32[1,128], index: 2, kind: input, shape index: {}]   ;;  %s826_s3 = inlined_call_operand.vmem [shape: f32[1,128], index: 3, kind: input, shape index: {}]   ;;  %s827_s4 = inlined_call_operand.vmem [shape: f32[128,128], index: 4, kind: output, shape index: {}]  }
   0x1   :  { %s778_s17 = smov 0  }
   0x2 LB: > { %s33_s18 = sadd.s32 1, %s742_s16  ;;  %p652_p0 = scmp.ge.s32.totalorder %s746_s17, 1  ;;  %s746_s17 = sphi %s778_s17, %s14_s17   ;;  %s742_s16 = sphi %s776_s16, %s829_s16   ;;  %s738_s15 = sphi %s774_s15, %s828_s15  }
   0x3   : > { %p35_p1 = scmp.ge.s32.totalorder %s33_s18, 2  ;;  %p221_p2 = scmp.lt.s32.totalorder %s746_s17, 3 }
   0x5   : > { %s831_s18 = smov (%p35_p1, %s33_s18), 0  ;;  %p222_p3 = pnand %p652_p0, %p221_p2 }
   0x6   : > { %v718_v0 = vld [vmem:[%s824_s1] sm:$0xff] (!%p222_p3)   ;;  %vm377_vm0 = vcmask (!%p222_p3), 1044480   ;;  %v719_v1 = vld [vmem:[%s824_s1 + $0x8] sm:$0x3f] (!%p222_p3)   ;;  %vm378_vm1 = vcmask (!%p222_p3), 1045504   ;;  %s653_s23 = sshll.u32 (!%p222_p3), %s738_s15, 3 }
   0x7   : > { %225 = sbr.rel (%p222_p3) target bundleno = 241 (0xf1), region = 36  ;;  %677 = vmatprep.subr.bf16.mxu0 (!%p222_p3), %v718_v0  ;;  %689 = vmatprep.subr.bf16.mxu1 (!%p222_p3), %v718_v0  ;;  %v748_v2 = vmov (!%p222_p3), 65535   ;;  %p268_p4 = scmp.lt.s32.totalorder (!%p222_p3), %s653_s23, 15  ;;  %vm364_vm2 = vcmask (!%p222_p3), 220160   ;;  %v667_v10 = vld [vmem:[%s825_s2] ss:$0 sm:$0xff] (!%p222_p3) }
   0x8   : > { %678 = vmatpush3.bf16.msra.mxu0 (!%p222_p3), %v718_v0  ;;  %691 = vmatpush3.bf16.msra.mxu1 (!%p222_p3), %v718_v0  ;;  %v379_v3 = vsel (!%p222_p3), %vm377_vm0, 4294967295, %v748_v2  ;;  %v668_v12 = vld [vmem:[%s826_s3] ss:$0 sm:$0xff] (!%p222_p3) }
   0x9   : > { %v380_v4 = vsel (!%p222_p3), %vm378_vm1, %v379_v3, 0 }
   0xa   : > { %v382_v5 = vand.u32 (!%p222_p3), %v719_v1, %v380_v4 }
   0xc   : > { %679 = vmatprep.subr.bf16.mxu0 (!%p222_p3), %v382_v5  ;;  %690 = vmatprep.subr.bf16.mxu1 (!%p222_p3), %v382_v5 }
   0xd   : > { %680 = vmatpush3.bf16.msra.mxu0 (!%p222_p3), %v382_v5  ;;  %692 = vmatpush3.bf16.msra.mxu1 (!%p222_p3), %v382_v5 }
   0xe   : > { %s833_s23 = smov (!%p268_p4, %s653_s23), 15 }
   0xf   : > { %s654_s24 = sshll.u32 %s833_s23, 2  ;;  %s656_s6 = sshll.u32 %s833_s23, 3 }
  0x10   : > { %s274_s27 = scalar_lea.vmem %s823_s0, %s654_s24  ;;  %s298_s9 = scalar_lea.vmem %s827_s4, %s656_s6 }
  0x11   : > { %v720_v6 = vld [vmem:[%s274_s27] sm:$0xff]   ;;  %v721_v7 = vld [vmem:[%s274_s27 + $0x10] sm:$0xff]   ;;  %v722_v8 = vld [vmem:[%s274_s27 + $0x8] sm:$0xff]  }
  0x12   : > { %681 = vmatprep.mubr.msk.bf16.mxu0 %vm364_vm2, %v720_v6  ;;  %685 = vmatprep.mubr.msk.bf16.mxu1 %vm364_vm2, %v721_v7  ;;  %v723_v9 = vld [vmem:[%s274_s27 + $0x18] sm:$0xff]  }
  0x13   : > { %682 = vmatmul.mubr.msk.bf16.vlgmr.msra.gmra.mrb[0].mxu0 %vm364_vm2, %v722_v8  ;;  %686 = vmatmul.mubr.msk.bf16.vlgmr.msra.gmra.mrb[0].mxu1 %vm364_vm2, %v723_v9 }
  0xe6   : > { %v683_v11 = vpop.f32.mrb[0].mxu0  ;;  %v687_v14 = vpop.f32.mrb[0].mxu1 }
  0xe7   : > { %v485_v13 = vmul.f32 %v683_v11, %v667_v10  ;;  %v418_v15 = vpop.f32.mrb[1].mxu0  ;;  %v489_v16 = vmul.f32 %v687_v14, %v667_v10  ;;  %v434_v18 = vpop.f32.mrb[1].mxu1 }
  0xe8   : > { %v483_v17 = vmul.f32 %v667_v10, %v418_v15  ;;  %v684_v19 = vpop.f32.mrb[2].mxu0  ;;  %v487_v21 = vmul.f32 %v667_v10, %v434_v18  ;;  %v688_v23 = vpop.f32.mrb[2].mxu1 }
  0xe9   : > { %v500_v20 = vadd.f32 %v668_v12, %v485_v13  ;;  %v486_v22 = vmul.f32 %v684_v19, %v667_v10  ;;  %v421_v24 = vpop.f32.mrb[3].mxu0  ;;  %v504_v25 = vadd.f32 %v668_v12, %v489_v16  ;;  %v490_v27 = vmul.f32 %v688_v23, %v667_v10  ;;  %v437_v29 = vpop.f32.mrb[3].mxu1 }
  0xea   : > { %v498_v26 = vadd.f32 %v668_v12, %v483_v17  ;;  %v484_v28 = vmul.f32 %v667_v10, %v421_v24  ;;  %v502_v31 = vadd.f32 %v668_v12, %v487_v21  ;;  %v488_v33 = vmul.f32 %v667_v10, %v437_v29 }
  0xeb   : > { %v508_v30 = vmax.f32 %v500_v20, 0.0  ;;  %v501_v32 = vadd.f32 %v668_v12, %v486_v22  ;;  %v512_v34 = vmax.f32 %v504_v25, 0.0  ;;  %v505_v36 = vadd.f32 %v668_v12, %v490_v27 }
  0xec   : > { %v506_v35 = vmax.f32 %v498_v26, 0.0  ;;  %v499_v37 = vadd.f32 %v668_v12, %v484_v28  ;;  %v510_v38 = vmax.f32 %v502_v31, 0.0  ;;  %v503_v40 = vadd.f32 %v668_v12, %v488_v33 }
  0xed   : > { %516 = vst [vmem:[%s298_s9 + $0x10] sm:$0xff] %v508_v30  ;;  %v509_v39 = vmax.f32 %v501_v32, 0.0  ;;  %520 = vst [vmem:[%s298_s9 + $0x30] sm:$0xff] %v512_v34  ;;  %v513_v41 = vmax.f32 %v505_v36, 0.0 }
  0xee   : > { %514 = vst [vmem:[%s298_s9] sm:$0xff] %v506_v35  ;;  %v507_v42 = vmax.f32 %v499_v37, 0.0  ;;  %518 = vst [vmem:[%s298_s9 + $0x20] sm:$0xff] %v510_v38  ;;  %v511_v43 = vmax.f32 %v503_v40, 0.0 }
  0xef   : > { %517 = vst [vmem:[%s298_s9 + $0x18] sm:$0xff] %v509_v39  ;;  %521 = vst [vmem:[%s298_s9 + $0x38] sm:$0xff] %v513_v41 }
  0xf0   : > { %515 = vst [vmem:[%s298_s9 + $0x8] sm:$0xff] %v507_v42  ;;  %519 = vst [vmem:[%s298_s9 + $0x28] sm:$0xff] %v511_v43 }
  0xf1 PF: > { %s14_s17 = sadd.s32 1, %s746_s17   ;;  %s828_s15 = smov %s742_s16 }
  0xf2   : > { %p11_p5 = scmp.ge.s32.totalorder %s14_s17, 4   ;;  %s829_s16 = smov %s831_s18 }
  0xf4   :  { %13 = sbr.rel (!%p11_p5) target bundleno = 2 (0x2), region = 83 }

// kernel: patch_embedding_forward.7
= control target key start
LH: loop header
LB: loop body
LE: loop exit
PB: predicated region body
PF: predicated region fallthrough
CT: control target
= control target key end

     0   :  { %s1072_s15 = smov 0   ;;  %s1074_s16 = smov 0   ;;  %s1207_s0 = inlined_call_operand.vmem [shape: bf16[32,1152], index: 0, kind: input, shape index: {}]   ;;  %s1208_s1 = inlined_call_operand.vmem [shape: bf16[1152,128], index: 1, kind: input, shape index: {}]   ;;  %s1209_s2 = inlined_call_operand.vmem [shape: f32[1,128], index: 2, kind: input, shape index: {}]   ;;  %s1210_s3 = inlined_call_operand.vmem [shape: f32[1,128], index: 3, kind: input, shape index: {}]   ;;  %s1211_s4 = inlined_call_operand.vmem [shape: f32[32,128], index: 4, kind: output, shape index: {}]  }
   0x1   :  { %s1076_s17 = smov 0   ;;  %s1078_s18 = smov 0  }
   0x2   :  { %s1080_s19 = smov 0   ;;  %s1082_s20 = smov 0  }
   0x3   :  { %s1084_s21 = smov 0  }
   0x4 LB: > { %s26_s22 = sadd.s32 1, %s1034_s19  ;;  %s33_s23 = sadd.s32 1, %s1038_s20  ;;  %s1042_s21 = sphi %s1084_s21, %s14_s21   ;;  %s1038_s20 = sphi %s1082_s20, %s1217_s20   ;;  %s1034_s19 = sphi %s1080_s19, %s1216_s19   ;;  %s1030_s18 = sphi %s1078_s18, %s1215_s18   ;;  %s1026_s17 = sphi %s1076_s17, %s1214_s17   ;;  %s1022_s16 = sphi %s1074_s16, %s1213_s16   ;;  %s1018_s15 = sphi %s1072_s15, %s1212_s15  }
   0x5   : > { %p27_p0 = scmp.ge.s32.totalorder %s26_s22, 3  ;;  %p49_p1 = scmp.ne.s32.totalorder %s1022_s16, %s1018_s15 }
   0x6   : > { %p50_p2 = scmp.eq.s32.totalorder %s1042_s21, 0  ;;  %s42_s27 = sadd.s32 1, %s1022_s16 }
   0x7   : > { %s1219_s22 = smov (%p27_p0, %s26_s22), 0  ;;  %s1221_s23 = smov (!%p27_p0, %s33_s23), %s1038_s20 }
   0x8   : > { %p51_p3 = por %p50_p2, %p49_p1  ;;  %p35_p4 = scmp.ge.s32.totalorder %s1221_s23, 2 }
   0x9   : > { %s38_s24 = ssub.s32 %s1034_s19, %s1219_s22  ;;  %p802_p6 = scmp.ge.s32.totalorder %s1042_s21, 6 }
   0xa   : > { %s1223_s23 = smov (%p35_p4, %s1221_s23), 0 }
   0xb   : > { %s37_s25 = ssub.s32 %s1038_s20, %s1223_s23  ;;  %195 = sbr.rel (%p802_p6) target bundleno = 29 (0x1d), region = 24 }
   0xc   : > { %s39_s26 = sor.u32 %s38_s24, %s37_s25 }
   0xd   : > { %p40_p5 = scmp.eq.s32.totalorder %s39_s26, 0 }
   0xf   : > { %s1123_s28 = scalar_select %p40_p5, %s1022_s16, %s42_s27  }
  0x12   : > { %198 = sbr.rel (!%p51_p3) target bundleno = 29 (0x1d), region = 28  ;;  %s200_s29 = sand.u32 (%p51_p3), 1, %s1022_s16  }
  0x13   : > { %s204_s30 = smul.u32 (%p51_p3), 3, %s1034_s19 }
  0x14   : > { %s898_s5 = smul.u32 (%p51_p3), 24, %s200_s29 }
  0x15   : > { %s899_s6 = smul.u32 (%p51_p3), 18, %s1038_s20 }
  0x16   : > { %s202_s12 = scalar_lea.vmem (%p51_p3), [#allocation3], %s898_s5 }
  0x17   : > { %s206_s7 = sadd.s32 (%p51_p3), %s899_s6, %s204_s30 }
  0x18   : > { %s805_s8 = sshll.u32 (%p51_p3), %s206_s7, 2 }
  0x19   : > { %s208_s11 = scalar_lea.vmem %s1207_s0, %s805_s8 }
  0x1a   : > { %v223_v0 = vld [vmem:[%s208_s11] sm:$0xff]  ;;  %v806_v2 = vld [vmem:[%s208_s11 + $0x8] sm:$0xf]  ;;  %v808_v3 = vld [vmem:[%s208_s11 + $0x2c] sm:$0xf] }
  0x1b   : > { %v225_v1 = vld [vmem:[%s208_s11 + $0x24] sm:$0xff]  ;;  %224 = vst [vmem:[%s202_s12] sm:$0xff] %v223_v0  ;;  %807 = vst [vmem:[%s202_s12 + $0x8] sm:$0xf] %v806_v2 }
  0x1c   : > { %226 = vst [vmem:[%s202_s12 + $0xc] sm:$0xff] %v225_v1  ;;  %809 = vst [vmem:[%s202_s12 + $0x14] sm:$0xf] %v808_v3 }
  0x1d PF: > { %p810_p7 = scmp.ge.s32.totalorder %s1042_s21, 1  ;;  %p254_p8 = scmp.lt.s32.totalorder %s1042_s21, 7 }
  0x1f   : > { %p255_p9 = pnand %p810_p7, %p254_p8 }
  0x20   : > { %s261_s13 = sand.u32 (!%p255_p9), 1, %s1018_s15   ;;  %s305_s14 = smul.u32 (!%p255_p9), 48, %s1026_s17 }
  0x21   : > { %258 = sbr.rel (%p255_p9) target bundleno = 319 (0x13f), region = 58  ;;  %s812_s25 = sshll.u32 (!%p255_p9), %s1030_s18, 1 }
  0x22   : > { %s900_s24 = smul.u32 (!%p255_p9), 24, %s261_s13  ;;  %p306_p10 = scmp.lt.s32.totalorder (!%p255_p9), %s305_s14, 143 }
  0x23   : > { %p321_p11 = scmp.lt.s32.totalorder (!%p255_p9), %s812_s25, 3  ;;  %p814_p12 = scmp.ne.s32.totalorder (!%p255_p9), %s1026_s17, 0 }
  0x24   : > { %s1147_s15 = scalar_lea.vmem (!%p255_p9), [#allocation3], %s900_s24 }
  0x28   : > { %s1225_s14 = smov (!%p306_p10, %s305_s14), 143  ;;  %s1227_s25 = smov (!%p321_p11, %s812_s25), 3 }
  0x29   : > { %s811_s26 = sshll.u32 %s1225_s14, 2  ;;  %s813_s5 = sshll.u32 %s1227_s25, 3  ;;  %v1044_v4 = vmov (!%p814_p12), 0.0  }
  0x2a   : > { %s1140_s30 = scalar_lea.vmem %s1208_s1, %s811_s26  ;;  %s1145_s8 = scalar_lea.vmem %s1211_s4, %s813_s5  ;;  %334 = vst [vmem:[#allocation2] sm:$0xff] (!%p814_p12), %v1044_v4  ;;  %335 = vst [vmem:[#allocation2 + $0x8] sm:$0xff] (!%p814_p12), %v1044_v4 }
  0x2b   : > { %333 = sbr.rel (%p814_p12) target bundleno = 50 (0x32), region = 66 }
  0x32 PF: > { %v960_v5 = vld [vmem:[%s1140_s30 + $0x40] sm:$0xff]   ;;  %v1045_v6 = vmov 0.0   ;;  %vm1046_vm0 = vmmov 0   ;;  %v963_v9 = vld [vmem:[%s1140_s30 + $0x48] sm:$0xff]   ;;  %v966_v12 = vld [vmem:[%s1140_s30 + $0x50] sm:$0xff]   ;;  %p842_p13 = scmp.ne.s32.totalorder %s1026_s17, 2 }
  0x33   : > { %878 = vmatprep.subr.bf16.mxu1 %v1045_v6  ;;  %v961_v7 = vld [vmem:[%s1140_s30] sm:$0xff]   ;;  %847 = vmatprep.subr.bf16.mxu0 %v960_v5  ;;  %v964_v10 = vld [vmem:[%s1140_s30 + $0x8] sm:$0xff]   ;;  %v967_v13 = vld [vmem:[%s1140_s30 + $0x10] sm:$0xff]  }
  0x34   : > { %v962_v8 = vld [vmem:[%s1140_s30 + $0x80] sm:$0xff]   ;;  %894 = vmatprep.mubr.msk.bf16.mxu1 %vm1046_vm0, %v1045_v6  ;;  %848 = vmatpush3.bf16.msra.mxu0 %v961_v7  ;;  %v965_v11 = vld [vmem:[%s1140_s30 + $0x88] sm:$0xff]   ;;  %v968_v14 = vld [vmem:[%s1140_s30 + $0x90] sm:$0xff]  }
  0x35   : > { %879 = vmatpush3.bf16.msra.mxu1 %v962_v8  ;;  %849 = vmatprep.subr.bf16.mxu0 %v963_v9  ;;  %v969_v15 = vld [vmem:[%s1140_s30 + $0x58] sm:$0xff]   ;;  %v972_v18 = vld [vmem:[%s1140_s30 + $0x60] sm:$0xff]   ;;  %v975_v21 = vld [vmem:[%s1140_s30 + $0x68] sm:$0xff]  }
  0x36   : > { %880 = vmatprep.subr.bf16.mxu1 %v1045_v6  ;;  %v970_v16 = vld [vmem:[%s1140_s30 + $0x18] sm:$0xff]   ;;  %v973_v19 = vld [vmem:[%s1140_s30 + $0x20] sm:$0xff]   ;;  %v976_v22 = vld [vmem:[%s1140_s30 + $0x28] sm:$0xff]  }
  0x37   : > { %v971_v17 = vld [vmem:[%s1140_s30 + $0x98] sm:$0xff]   ;;  %v974_v20 = vld [vmem:[%s1140_s30 + $0xa0] sm:$0xff]   ;;  %v977_v23 = vld [vmem:[%s1140_s30 + $0xa8] sm:$0xff]  }
  0x38   : > { %850 = vmatpush3.bf16.msra.mxu0 %v964_v10  ;;  %v978_v24 = vld [vmem:[%s1140_s30 + $0x70] sm:$0xff]   ;;  %v981_v27 = vld [vmem:[%s1140_s30 + $0x78] sm:$0xff]   ;;  %v336_v39 = vld [vmem:[#allocation2] sm:$0xff] }
  0x39   : > { %881 = vmatpush3.bf16.msra.mxu1 %v965_v11  ;;  %851 = vmatprep.subr.bf16.mxu0 %v966_v12  ;;  %v979_v25 = vld [vmem:[%s1140_s30 + $0x30] sm:$0xff]   ;;  %v982_v29 = vld [vmem:[%s1140_s30 + $0x38] sm:$0xff]   ;;  %v337_v45 = vld [vmem:[#allocation2 + $0x8] sm:$0xff] }
  0x3a   : > { %882 = vmatprep.subr.bf16.mxu1 %v1045_v6  ;;  %v980_v26 = vld [vmem:[%s1140_s30 + $0xb0] sm:$0xff]   ;;  %v983_v30 = vld [vmem:[%s1140_s30 + $0xb8] sm:$0xff]   ;;  %v843_v50 = vld [vmem:[%s1209_s2] ss:$0 sm:$0xff] (!%p842_p13) }
  0x3b   : > { %v986_v28 = vld [vmem:[%s1147_s15 + $0x4] ss:$12 sps:$4 sm:$0xff]   ;;  %v984_v31 = vld [vmem:[%s1147_s15] ss:$12 sps:$4 sm:$0xff]   ;;  %v987_v32 = vld [vmem:[%s1147_s15 + $0x8] ss:$12 sps:$4 sm:$0xff]  }
  0x3c   : > { %852 = vmatpush3.bf16.msra.mxu0 %v967_v13  ;;  %582 = vmatprep.mubr.bf16.mxu0 %v986_v28  ;;  %v844_v51 = vld [vmem:[%s1210_s3] ss:$0 sm:$0xff] (!%p842_p13) }
  0x3d   : > { %883 = vmatpush3.bf16.msra.mxu1 %v968_v14  ;;  %853 = vmatprep.subr.bf16.mxu0 %v969_v15 }
  0x3e   : > { %884 = vmatprep.subr.bf16.mxu1 %v1045_v6 }
  0x40   : > { %854 = vmatpush3.bf16.msra.mxu0 %v970_v16 }
  0x41   : > { %885 = vmatpush3.bf16.msra.mxu1 %v971_v17  ;;  %855 = vmatprep.subr.bf16.mxu0 %v972_v18 }
  0x42   : > { %886 = vmatprep.subr.bf16.mxu1 %v1045_v6 }
  0x44   : > { %856 = vmatpush3.bf16.msra.mxu0 %v973_v19 }
  0x45   : > { %887 = vmatpush3.bf16.msra.mxu1 %v974_v20  ;;  %857 = vmatprep.subr.bf16.mxu0 %v975_v21 }
  0x46   : > { %888 = vmatprep.subr.bf16.mxu1 %v1045_v6 }
  0x48   : > { %858 = vmatpush3.bf16.msra.mxu0 %v976_v22 }
  0x49   : > { %889 = vmatpush3.bf16.msra.mxu1 %v977_v23  ;;  %859 = vmatprep.subr.bf16.mxu0 %v978_v24 }
  0x4a   : > { %890 = vmatprep.subr.bf16.mxu1 %v1045_v6 }
  0x4c   : > { %860 = vmatpush3.bf16.msra.mxu0 %v979_v25 }
  0x4d   : > { %891 = vmatpush3.bf16.msra.mxu1 %v980_v26  ;;  %861 = vmatprep.subr.bf16.mxu0 %v981_v27 }
  0x4e   : > { %892 = vmatprep.subr.bf16.mxu1 %v1045_v6 }
  0x50   : > { %862 = vmatpush3.bf16.msra.mxu0 %v982_v29 }
  0x51   : > { %893 = vmatpush3.bf16.msra.mxu1 %v983_v30 }
  0x53   : > { %583 = vmatmul.mubr.bf16.vlgmr.msra.gmra.mrb[0].mxu0 %v984_v31 }
  0x54   : > { %895 = vmatmul.mubr.bf16.vlgmr.msra.gmra.mrb[0].mxu1 %v987_v32 }
 0x126   : > { %v863_v33 = vpop.f32.mrb[0].mxu0 }
 0x127   : > { %v625_v34 = vpop.f32.mrb[0].mxu1  ;;  %v864_v35 = vpop.f32.mrb[1].mxu0 }
 0x128   : > { %v865_v36 = vadd.f32 %v864_v35, %v863_v33  ;;  %v896_v37 = vpop.f32.mrb[1].mxu1  ;;  %v866_v38 = vpop.f32.mrb[2].mxu0 }
 0x129   : > { %v628_v40 = vpop.f32.mrb[2].mxu1  ;;  %v867_v41 = vpop.f32.mrb[3].mxu0 }
 0x12a   : > { %v626_v42 = vadd.f32 %v865_v36, %v625_v34  ;;  %v868_v43 = vadd.f32 %v867_v41, %v866_v38  ;;  %v897_v44 = vpop.f32.mrb[3].mxu1  ;;  %639 = sbr.rel (%p842_p13) target bundleno = 319 (0x13f), region = 70 }
 0x12c   : > { %v632_v46 = vadd.f32 %v626_v42, %v336_v39  ;;  %v629_v47 = vadd.f32 %v868_v43, %v628_v40 }
 0x12e   : > { %634 = vst [vmem:[#allocation2] sm:$0xff] %v632_v46  ;;  %v633_v48 = vadd.f32 %v629_v47, %v337_v45 }
 0x130   : > { %635 = vst [vmem:[#allocation2 + $0x8] sm:$0xff] %v633_v48 }
 0x135   : > { %v640_v49 = vld [vmem:[#allocation2] sm:$0xff] }
 0x136   : > { %v649_v52 = vmul.f32 %v843_v50, %v640_v49 }
 0x137   : > { %v641_v53 = vld [vmem:[#allocation2 + $0x8] sm:$0xff] }
 0x138   : > { %v650_v54 = vmul.f32 %v843_v50, %v641_v53  ;;  %v658_v55 = vadd.f32 %v844_v51, %v649_v52 }
 0x13a   : > { %v659_v56 = vadd.f32 %v844_v51, %v650_v54  ;;  %v660_v57 = vmax.f32 %v658_v55, 0.0 }
 0x13c   : > { %v661_v58 = vmax.f32 %v659_v56, 0.0  ;;  %662 = vst [vmem:[%s1145_s8] sm:$0xff] %v660_v57 }
 0x13e   : > { %663 = vst [vmem:[%s1145_s8 + $0x8] sm:$0xff] %v661_v58 }
 0x13f PF: > { %s14_s21 = sadd.s32 1, %s1042_s21   ;;  %s1212_s15 = smov %s1022_s16 }
 0x140   : > { %p11_p0 = scmp.ge.s32.totalorder %s14_s21, 8   ;;  %s1213_s16 = smov %s1123_s28 }
 0x141   : > { %s1214_s17 = smov %s1034_s19  ;;  %s1215_s18 = smov %s1038_s20 }
 0x142   : > { %s1216_s19 = smov %s1219_s22  ;;  %s1217_s20 = smov %s1223_s23 }
 0x143   :  { %13 = sbr.rel (!%p11_p0) target bundleno = 4 (0x4), region = 120 }

// kernel: patch_embedding_forward.10
= control target key start
LH: loop header
LB: loop body
LE: loop exit
PB: predicated region body
PF: predicated region fallthrough
CT: control target
= control target key end

     0   :  { %s645_s12 = smov 0   ;;  %s647_s13 = smov 0   ;;  %s705_s0 = inlined_call_operand.vmem [shape: bf16[32,128], index: 0, kind: input, shape index: {}]   ;;  %s706_s1 = inlined_call_operand.vmem [shape: bf16[128,128], index: 1, kind: input, shape index: {}]   ;;  %s707_s2 = inlined_call_operand.vmem [shape: f32[1,128], index: 2, kind: input, shape index: {}]   ;;  %s708_s3 = inlined_call_operand.vmem [shape: f32[32,128], index: 3, kind: output, shape index: {}]  }
   0x1   :  { %s649_s14 = smov 0  }
   0x2 LB: > { %s32_s15 = sadd.s32 1, %s617_s13  ;;  %p518_p0 = scmp.ge.s32.totalorder %s621_s14, 1  ;;  %s621_s14 = sphi %s649_s14, %s13_s14   ;;  %s617_s13 = sphi %s647_s13, %s710_s13   ;;  %s613_s12 = sphi %s645_s12, %s709_s12  }
   0x3   : > { %p34_p1 = scmp.ge.s32.totalorder %s32_s15, 2  ;;  %p188_p2 = scmp.lt.s32.totalorder %s621_s14, 3 }
   0x5   : > { %s712_s15 = smov (%p34_p1, %s32_s15), 0  ;;  %p189_p3 = pnand %p518_p0, %p188_p2 }
   0x6   : > { %v590_v0 = vld [vmem:[%s706_s1] sm:$0xff] (!%p189_p3)   ;;  %v623_v1 = vmov (!%p189_p3), 0.0   ;;  %v591_v2 = vld [vmem:[%s706_s1 + $0x8] sm:$0xff] (!%p189_p3)   ;;  %vm624_vm0 = vmmov (!%p189_p3), 0   ;;  %s519_s20 = sshll.u32 (!%p189_p3), %s613_s12, 1  ;;  %v592_v3 = vld [vmem:[%s706_s1 + $0x10] sm:$0xff] (!%p189_p3)  }
   0x7   : > { %192 = sbr.rel (%p189_p3) target bundleno = 256 (0x100), region = 32  ;;  %544 = vmatprep.subr.bf16.mxu0 (!%p189_p3), %v623_v1  ;;  %560 = vmatprep.mubr.msk.bf16.mxu0 (!%p189_p3), %vm624_vm0, %v623_v1  ;;  %p230_p4 = scmp.lt.s32.totalorder (!%p189_p3), %s519_s20, 3  ;;  %v593_v4 = vld [vmem:[%s706_s1 + $0x18] sm:$0xff] (!%p189_p3)   ;;  %v594_v5 = vld [vmem:[%s706_s1 + $0x20] sm:$0xff] (!%p189_p3)   ;;  %v595_v6 = vld [vmem:[%s706_s1 + $0x28] sm:$0xff] (!%p189_p3)  }
   0x8   : > { %545 = vmatpush3.bf16.msra.mxu0 (!%p189_p3), %v590_v0  ;;  %v596_v7 = vld [vmem:[%s706_s1 + $0x30] sm:$0xff] (!%p189_p3)   ;;  %v597_v8 = vld [vmem:[%s706_s1 + $0x38] sm:$0xff] (!%p189_p3)   ;;  %v532_v10 = vld [vmem:[%s707_s2] ss:$0 sm:$0xff] (!%p189_p3) }
   0x9   : > { %546 = vmatprep.subr.bf16.mxu0 (!%p189_p3), %v623_v1 }
   0xc   : > { %547 = vmatpush3.bf16.msra.mxu0 (!%p189_p3), %v591_v2 }
   0xd   : > { %548 = vmatprep.subr.bf16.mxu0 (!%p189_p3), %v623_v1 }
   0xe   : > { %s714_s20 = smov (!%p230_p4, %s519_s20), 3 }
   0xf   : > { %s520_s23 = sshll.u32 %s714_s20, 2  ;;  %s522_s10 = sshll.u32 %s714_s20, 3 }
  0x10   : > { %s236_s26 = scalar_lea.vmem %s705_s0, %s520_s23  ;;  %549 = vmatpush3.bf16.msra.mxu0 %v592_v3  ;;  %s257_s18 = scalar_lea.vmem %s708_s3, %s522_s10 }
  0x11   : > { %550 = vmatprep.subr.bf16.mxu0 %v623_v1  ;;  %v598_v9 = vld [vmem:[%s236_s26] sm:$0xff]  }
  0x14   : > { %551 = vmatpush3.bf16.msra.mxu0 %v593_v4 }
  0x15   : > { %552 = vmatprep.subr.bf16.mxu0 %v623_v1 }
  0x18   : > { %553 = vmatpush3.bf16.msra.mxu0 %v594_v5 }
  0x19   : > { %554 = vmatprep.subr.bf16.mxu0 %v623_v1 }
  0x1c   : > { %555 = vmatpush3.bf16.msra.mxu0 %v595_v6 }
  0x1d   : > { %556 = vmatprep.subr.bf16.mxu0 %v623_v1 }
  0x20   : > { %557 = vmatpush3.bf16.msra.mxu0 %v596_v7 }
  0x21   : > { %558 = vmatprep.subr.bf16.mxu0 %v623_v1 }
  0x24   : > { %559 = vmatpush3.bf16.msra.mxu0 %v597_v8 }
  0x27   : > { %561 = vmatmul.mubr.bf16.vlgmr.msra.gmra.mrb[0].mxu0 %v598_v9 }
  0xfa   : > { %v374_v11 = vpop.f32.mrb[0].mxu0 }
  0xfb   : > { %v397_v12 = vadd.f32 %v532_v10, %v374_v11  ;;  %v562_v13 = vpop.f32.mrb[1].mxu0 }
  0xfc   : > { %v377_v14 = vpop.f32.mrb[2].mxu0 }
  0xfd   : > { %399 = vst [vmem:[%s257_s18] sm:$0xff] %v397_v12  ;;  %v398_v15 = vadd.f32 %v532_v10, %v377_v14  ;;  %v563_v16 = vpop.f32.mrb[3].mxu0 }
  0xff   : > { %400 = vst [vmem:[%s257_s18 + $0x8] sm:$0xff] %v398_v15 }
 0x100 PF: > { %s13_s14 = sadd.s32 1, %s621_s14   ;;  %s709_s12 = smov %s617_s13 }
 0x101   : > { %p10_p5 = scmp.ge.s32.totalorder %s13_s14, 4   ;;  %s710_s13 = smov %s712_s15 }
 0x103   :  { %12 = sbr.rel (!%p10_p5) target bundleno = 2 (0x2), region = 76 }

// kernel: patch_embedding_forward.11
= control target key start
LH: loop header
LB: loop body
LE: loop exit
PB: predicated region body
PF: predicated region fallthrough
CT: control target
= control target key end

     0   :  { %s348_s12 = smov 0   ;;  %s382_s0 = inlined_call_operand.vmem [shape: f32[2,16,128], index: 0, kind: input, shape index: {}]   ;;  %s383_s1 = inlined_call_operand.vmem [shape: f32[1,128], index: 1, kind: input, shape index: {}]   ;;  %s384_s2 = inlined_call_operand.vmem [shape: f32[1,128], index: 2, kind: input, shape index: {}]   ;;  %s385_s3 = inlined_call_operand.vmem [shape: f32[2,16,128], index: 3, kind: output, shape index: {}]  }
   0x1 LB: > { %s289_s13 = sadd.s32 4294967295, %s326_s12   ;;  %p293_p0 = scmp.ge.s32.totalorder %s326_s12, 1  ;;  %s326_s12 = sphi %s348_s12, %s13_s12  }
   0x2   : > { %p137_p1 = scmp.lt.s32.totalorder %s326_s12, 3 }
   0x4   : > { %p138_p2 = pnand %p293_p0, %p137_p1 }
   0x5   : > { %p161_p3 = scmp.lt.s32.totalorder (!%p138_p2), %s289_s13, 1  ;;  %v173_v0 = vlaneseq (!%p138_p2)  ;;  %v298_v32 = vld [vmem:[%s383_s1] ss:$0 sm:$0xff] (!%p138_p2) }
   0x6   : > { %141 = sbr.rel (%p138_p2) target bundleno = 512 (0x200), region = 32  ;;  %v299_v35 = vld [vmem:[%s384_s2] ss:$0 sm:$0xff] (!%p138_p2) }
   0x7   : > { %v174_v1 = vand.u32 (!%p138_p2), 127, %v173_v0 }
   0x9   : > { %vm175_vm0 = vcmp.lt.s32.totalorder (!%p138_p2), %v174_v1, 32 }
   0xd   : > { %s387_s13 = smov (!%p161_p3, %s289_s13), 1 }
   0xe   : > { %s302_s14 = sshll.u32 %s387_s13, 4 }
   0xf   : > { %s165_s17 = scalar_lea.vmem %s382_s0, %s302_s14  ;;  %s170_s30 = scalar_lea.vmem %s385_s3, %s302_s14 }
  0x10   : > { %v171_v2 = vld [vmem:[%s165_s17] sm:$0xff]  ;;  %v172_v3 = vld [vmem:[%s165_s17 + $0x8] sm:$0xff] }
  0x11   : > { %v176_v4 = vsel %vm175_vm0, %v171_v2, 0.0  ;;  %v177_v5 = vsel %vm175_vm0, %v172_v3, 0.0 }
  0x12   : > { %v178_v6 = vadd.f32 %v177_v5, %v176_v4 }
  0x14   : > { %179 = vadd.xlane.f32.xlu0 %v178_v6 }
  0xa1   : > { %v180_v7 = vpop.xlane.xlu0 %179 }
  0xa2   : > { %v181_v8 = vrot.slane %v180_v7, 4 }
  0xa4   : > { %v182_v9 = vadd.f32 %v181_v8, %v180_v7 }
  0xa6   : > { %v183_v10 = vrot.slane %v182_v9, 2 }
  0xa8   : > { %v184_v11 = vadd.f32 %v183_v10, %v182_v9 }
  0xaa   : > { %v185_v12 = vrot.slane %v184_v11, 1 }
  0xac   : > { %v186_v13 = vadd.f32 %v185_v12, %v184_v11 }
  0xae   : > { %304 = vpush %v186_v13 }
  0xdf   : > { %s305_s18 = spop %304 }
  0xe0   : > { %s188_s19 = smul.f32 0.001953125, %s305_s18 }
  0xe2   : > { %v189_v14 = vstv %s188_s19 }
  0xe3   : > { %v190_v15 = vsub.f32 %v171_v2, %v189_v14  ;;  %v191_v16 = vsub.f32 %v172_v3, %v189_v14 }
  0xe5   : > { %v192_v17 = vsel %vm175_vm0, %v190_v15, 0.0  ;;  %v193_v18 = vsel %vm175_vm0, %v191_v16, 0.0 }
  0xe6   : > { %v194_v19 = vmul.f32 %v192_v17, %v192_v17  ;;  %v195_v20 = vmul.f32 %v193_v18, %v193_v18 }
  0xe8   : > { %v196_v21 = vadd.f32 %v195_v20, %v194_v19 }
  0xea   : > { %197 = vadd.xlane.f32.xlu0 %v196_v21 }
 0x177   : > { %v198_v22 = vpop.xlane.xlu0 %197 }
 0x178   : > { %v199_v23 = vrot.slane %v198_v22, 4 }
 0x17a   : > { %v200_v24 = vadd.f32 %v199_v23, %v198_v22 }
 0x17c   : > { %v201_v25 = vrot.slane %v200_v24, 2 }
 0x17e   : > { %v202_v26 = vadd.f32 %v201_v25, %v200_v24 }
 0x180   : > { %v203_v27 = vrot.slane %v202_v26, 1 }
 0x182   : > { %v204_v28 = vadd.f32 %v203_v27, %v202_v26 }
 0x184   : > { %306 = vpush %v204_v28 }
 0x1b5   : > { %s307_s20 = spop %306 }
 0x1b6   : > { %s206_s21 = smul.f32 0.001953125, %s307_s20 }
 0x1b8   : > { %s207_s22 = sadd.f32 1e-05, %s206_s21 }
 0x1ba   : > { %v208_v29 = vstv %s207_s22 }
 0x1bb   : > { %318 = vrsqrt.f32 %v208_v29 }
 0x1c5   : > { %v319_v30 = vpop.eup %318 }
 0x1c6   : > { %308 = vpush %v319_v30 }
 0x1f7   : > { %s309_s23 = spop %308 }
 0x1f8   : > { %v211_v31 = vstv %s309_s23 }
 0x1f9   : > { %v212_v33 = vmul.f32 %v211_v31, %v192_v17  ;;  %v213_v34 = vmul.f32 %v211_v31, %v193_v18 }
 0x1fb   : > { %v221_v36 = vmul.f32 %v298_v32, %v212_v33  ;;  %v222_v37 = vmul.f32 %v298_v32, %v213_v34 }
 0x1fd   : > { %v230_v38 = vadd.f32 %v299_v35, %v221_v36  ;;  %v231_v39 = vadd.f32 %v299_v35, %v222_v37 }
 0x1ff   : > { %232 = vst [vmem:[%s170_s30] sm:$0xff] %v230_v38  ;;  %233 = vst [vmem:[%s170_s30 + $0x8] sm:$0xff] %v231_v39 }
 0x200 PF: > { %s13_s12 = sadd.s32 1, %s326_s12  }
 0x201   : > { %p10_p4 = scmp.ge.s32.totalorder %s13_s12, 4  }
 0x203   :  { %12 = sbr.rel (!%p10_p4) target bundleno = 1 (0x1), region = 62 }

</bundles_post_ra>
